<compile_context>
chip_gen: v5e
topology: v5e:2x2
jax: 0.10.0
libtpu: 0.0.40
codegen_flags: <defaults>
</compile_context>

<pallas_src>
import jax
import jax.numpy as jnp
from jax.experimental import pallas as pl
from jax.experimental.pallas import tpu as pltpu


def _mlp_kernel_folded(x_ref, w0x_ref, b0_ref, w1_ref, b1_ref, w2_ref, b2_ref,
                       o_ref):
    """Latent code already folded into b0 (batch-1 code branch)."""
    cd = w0x_ref.dtype  # compute dtype for MXU operands (bf16 or f32)
    h = jnp.dot(x_ref[...].astype(cd), w0x_ref[...],
                preferred_element_type=jnp.float32) + b0_ref[...]
    h = jnp.maximum(h, 0.0)  # ReLU in f32
    h = jnp.dot(h.astype(cd), w1_ref[...],
                preferred_element_type=jnp.float32) + b1_ref[...]
    h = jnp.maximum(h, 0.0)
    h = jnp.dot(h.astype(cd), w2_ref[...],
                preferred_element_type=jnp.float32) + b2_ref[...]
    o_ref[...] = h.astype(o_ref.dtype)


def _mlp_kernel_split(x_ref, c_ref, w0x_ref, w0c_ref, b0_ref,
                      w1_ref, b1_ref, w2_ref, b2_ref, o_ref):
    """Per-row latent code: first layer is x@W0x + code@W0c (no concat)."""
    cd = w0x_ref.dtype
    h = (jnp.dot(x_ref[...].astype(cd), w0x_ref[...],
                 preferred_element_type=jnp.float32)
         + jnp.dot(c_ref[...].astype(cd), w0c_ref[...],
                   preferred_element_type=jnp.float32)
         + b0_ref[...])
    h = jnp.maximum(h, 0.0)
    h = jnp.dot(h.astype(cd), w1_ref[...],
                preferred_element_type=jnp.float32) + b1_ref[...]
    h = jnp.maximum(h, 0.0)
    h = jnp.dot(h.astype(cd), w2_ref[...],
                preferred_element_type=jnp.float32) + b2_ref[...]
    o_ref[...] = h.astype(o_ref.dtype)


def deform_network_forward(x, shape_latent_code, params, *, tile_m=4096,
                           use_bf16=True):
    """Pallas forward pass of DeformNetwork (multires=0).

    x:                 (N, d_in) float32
    shape_latent_code: (N, C) or (1, C) float32
    params: dict with w0,b0,w1,b1,w2,b2 (weights as (in, out), biases (1, out))
    tile_m: row tile (sweep 1024-8192; per-grid-step overhead amortization)
    use_bf16: cast matmul operands to bf16 (f32 accumulation) for the MXU
    """
    n, d_in_x = x.shape
    code_dim = shape_latent_code.shape[1]
    w0, b0 = params["w0"], params["b0"]
    w1, b1 = params["w1"], params["b1"]
    w2, b2 = params["w2"], params["b2"]
    assert w0.shape[0] == d_in_x + code_dim, \
        "in deform net, shape_code.dim != x.dim"
    d_out = w2.shape[1]

    # Split the first layer's contraction so no concat is ever materialized:
    # [x | code] @ W0 == x @ W0x + code @ W0c     (tiny weight slices, one-off)
    w0x = w0[:d_in_x]
    w0c = w0[d_in_x:]

    cd = jnp.bfloat16 if use_bf16 else jnp.float32
    w0x_c, w0c_c = w0x.astype(cd), w0c.astype(cd)
    w1_c, w2_c = w1.astype(cd), w2.astype(cd)
    b0_f = b0.astype(jnp.float32)
    b1_f = b1.astype(jnp.float32)
    b2_f = b2.astype(jnp.float32)
    x = x.astype(jnp.float32)  # cast to bf16 happens in-kernel (free on VPU)

    # Clamp the row tile for small inputs (keep sublane multiple of 8);
    # boundary blocks of a non-divisible grid are masked by Pallas.
    tile_m = min(tile_m, max(8, -(-n // 8) * 8))
    grid = (pl.cdiv(n, tile_m),)

    const = lambda shape: pl.BlockSpec(shape, lambda i: (0, 0))  # VMEM-resident
    row = lambda d: pl.BlockSpec((tile_m, d), lambda i: (i, 0))

    compiler_params = pltpu.CompilerParams(
        dimension_semantics=("parallel",),           # v7x: shard rows over 2 TCs
        vmem_limit_bytes=32 * 1024 * 1024)           # headroom over v5e default

    out_shape = jax.ShapeDtypeStruct((n, d_out), jnp.float32)

    if shape_latent_code.shape[0] == 1:
        # Batch-1 latent code (PyTorch `repeat` branch): fold its contribution
        # into the first-layer bias in f32 -> no (N, C) broadcast in HBM.
        b0_eff = (shape_latent_code.astype(jnp.float32)
                  @ w0c.astype(jnp.float32)) + b0_f
        return pl.pallas_call(
            _mlp_kernel_folded,
            out_shape=out_shape,
            grid_spec=pltpu.PrefetchScalarGridSpec(
                num_scalar_prefetch=0,
                grid=grid,
                in_specs=[row(d_in_x),
                          const(w0x_c.shape), const(b0_eff.shape),
                          const(w1_c.shape), const(b1_f.shape),
                          const(w2_c.shape), const(b2_f.shape)],
                out_specs=row(d_out)),
            compiler_params=compiler_params,
        )(x, w0x_c, b0_eff, w1_c, b1_f, w2_c, b2_f)

    assert shape_latent_code.shape[0] == n, \
        "in deform net, shape_code.dim != x.dim"
    code = shape_latent_code.astype(jnp.float32)
    return pl.pallas_call(
        _mlp_kernel_split,
        out_shape=out_shape,
        grid_spec=pltpu.PrefetchScalarGridSpec(
            num_scalar_prefetch=0,
            grid=grid,
            in_specs=[row(d_in_x), row(code_dim),
                      const(w0x_c.shape), const(w0c_c.shape), const(b0_f.shape),
                      const(w1_c.shape), const(b1_f.shape),
                      const(w2_c.shape), const(b2_f.shape)],
            out_specs=row(d_out)),
        compiler_params=compiler_params,
    )(x, code, w0x_c, w0c_c, b0_f, w1_c, b1_f, w2_c, b2_f)


def init_deform_network_params(key, shape_code_dim=32, dims=(64, 64),
                               d_in=3, d_out=3, deform_feature_dim=128,
                               weight_norm=True):
    """Deterministic parameter init mirroring nn.Linear + weight_norm shapes."""
    d_out = d_out + deform_feature_dim
    layer_dims = [d_in + shape_code_dim] + list(dims) + [d_out]
    params = {}
    for l in range(len(layer_dims) - 1):
        fan_in, fan_out = layer_dims[l], layer_dims[l + 1]
        key, kv, kg, kb = jax.random.split(key, 4)
        bound = 1.0 / jnp.sqrt(fan_in)
        # v plays the role of weight_norm's direction parameter, stored (out, in)
        v = jax.random.uniform(kv, (fan_out, fan_in), jnp.float32, -bound, bound)
        b = jax.random.uniform(kb, (fan_out,), jnp.float32, -bound, bound)
        if weight_norm:
            g = jax.random.uniform(kg, (fan_out, 1), jnp.float32, 0.5, 1.5)
            w = g * v / jnp.linalg.norm(v, axis=1, keepdims=True)
        else:
            w = v
        # store transposed (in, out) so the kernel computes h @ W + b
        params[f"w{l}"] = jnp.asarray(w.T)
        params[f"b{l}"] = jnp.asarray(b)[None, :]
    return params, layer_dims


def _reference_forward(x, code, params):
    if code.shape[0] != x.shape[0] and code.shape[0] == 1:
        code = jnp.broadcast_to(code, (x.shape[0], code.shape[1]))
    h = jnp.concatenate([x, code], axis=-1)
    h = jnp.maximum(h @ params["w0"] + params["b0"], 0.0)
    h = jnp.maximum(h @ params["w1"] + params["b1"], 0.0)
    return h @ params["w2"] + params["b2"]


if __name__ == "__main__":
    key = jax.random.PRNGKey(0)
    kp, kx, kc, kx2 = jax.random.split(key, 4)

    shape_code_dim = 32
    n_points = 256

    params, layer_dims = init_deform_network_params(kp, shape_code_dim=shape_code_dim)

    x = jax.random.normal(kx, (n_points, 3), jnp.float32)
    # latent code with batch 1, exercising the PyTorch repeat/broadcast branch
    code1 = jax.random.normal(kc, (1, shape_code_dim), jnp.float32)

    ref = _reference_forward(x, code1, params)

    # 1) batch-1 code, f32 operands (exact-path check of the folded kernel)
    out_f32 = jax.block_until_ready(
        deform_network_forward(x, code1, params, use_bf16=False))
    assert out_f32.shape == (n_points, layer_dims[-1]), out_f32.shape
    assert jnp.allclose(out_f32, ref, atol=1e-3, rtol=1e-3), \
        "f32 folded path mismatch vs reference"

    # 2) batch-1 code, bf16 MXU operands (default fast path, looser tolerance)
    out_bf16 = jax.block_until_ready(deform_network_forward(x, code1, params))
    assert out_bf16.shape == (n_points, layer_dims[-1]), out_bf16.shape
    assert float(jnp.max(jnp.abs(out_bf16 - ref))) < 1e-1, \
        "bf16 folded path mismatch vs reference"

    # 3) per-row code, f32 operands (exact-path check of the split kernel)
    code_n = jnp.broadcast_to(code1, (n_points, shape_code_dim))
    out_split = jax.block_until_ready(
        deform_network_forward(x, code_n, params, use_bf16=False))
    assert jnp.allclose(out_split, ref, atol=1e-3, rtol=1e-3), \
        "f32 split path mismatch vs reference"

    # 4) multi-block grid with a ragged boundary (n not divisible by tile_m):
    #    exercises pl.cdiv grid + Pallas boundary masking on both in/out blocks.
    n_ragged = 300
    x2 = jax.random.normal(kx2, (n_ragged, 3), jnp.float32)
    ref2 = _reference_forward(x2, code1, params)
    out_ragged = jax.block_until_ready(
        deform_network_forward(x2, code1, params, tile_m=128, use_bf16=False))
    assert out_ragged.shape == (n_ragged, layer_dims[-1]), out_ragged.shape
    assert jnp.allclose(out_ragged, ref2, atol=1e-3, rtol=1e-3), \
        "ragged multi-block path mismatch vs reference"

    print("KERNEL_OK")
</pallas_src>

<mosaic_0001>
module attributes {stable_mosaic.version = 11 : i64} {
  func.func @_mlp_kernel_folded(%arg0: i32, %arg1: memref<256x3xf32, #tpu.memory_space<vmem>>, %arg2: memref<3x64xf32, #tpu.memory_space<vmem>>, %arg3: memref<1x64xf32, #tpu.memory_space<vmem>>, %arg4: memref<64x64xf32, #tpu.memory_space<vmem>>, %arg5: memref<1x64xf32, #tpu.memory_space<vmem>>, %arg6: memref<64x131xf32, #tpu.memory_space<vmem>>, %arg7: memref<1x131xf32, #tpu.memory_space<vmem>>, %arg8: memref<256x131xf32, #tpu.memory_space<vmem>>) attributes {dimension_semantics = [#tpu.dimension_semantics<parallel>], iteration_bounds = array<i64: 1>, scalar_prefetch = 0 : i64, scratch_operands = 0 : i64, tpu.core_type = #tpu.core_type<tc>, window_params = [{transform_indices = @transform_0, window_bounds = array<i64: 256, 3>}, {pipeline_mode = #tpu.pipeline_mode<synchronous>, transform_indices = @transform_1, window_bounds = array<i64: 3, 64>}, {pipeline_mode = #tpu.pipeline_mode<synchronous>, transform_indices = @transform_2, window_bounds = array<i64: 1, 64>}, {pipeline_mode = #tpu.pipeline_mode<synchronous>, transform_indices = @transform_3, window_bounds = array<i64: 64, 64>}, {pipeline_mode = #tpu.pipeline_mode<synchronous>, transform_indices = @transform_4, window_bounds = array<i64: 1, 64>}, {pipeline_mode = #tpu.pipeline_mode<synchronous>, transform_indices = @transform_5, window_bounds = array<i64: 64, 131>}, {pipeline_mode = #tpu.pipeline_mode<synchronous>, transform_indices = @transform_6, window_bounds = array<i64: 1, 131>}, {transform_indices = @transform_7, window_bounds = array<i64: 256, 131>}]} {
    %c0 = arith.constant 0 : index
    %c0_0 = arith.constant 0 : index
    %0 = vector.load %arg1[%c0, %c0_0] : memref<256x3xf32, #tpu.memory_space<vmem>>, vector<256x3xf32>
    %c0_1 = arith.constant 0 : index
    %c0_2 = arith.constant 0 : index
    %1 = vector.load %arg2[%c0_1, %c0_2] : memref<3x64xf32, #tpu.memory_space<vmem>>, vector<3x64xf32>
    %cst = arith.constant dense<0.000000e+00> : vector<256x64xf32>
    %2 = tpu.matmul %0, %1, %cst {dimension_numbers = #tpu.dot_dimension_numbers<[1], [0], [0], [1], [0, 0, 1, 1], [], []>} : vector<256x3xf32>, vector<3x64xf32>, vector<256x64xf32> -> vector<256x64xf32>
    %c0_3 = arith.constant 0 : index
    %c0_4 = arith.constant 0 : index
    %3 = vector.load %arg3[%c0_3, %c0_4] : memref<1x64xf32, #tpu.memory_space<vmem>>, vector<1x64xf32>
    %4 = vector.broadcast %3 : vector<1x64xf32> to vector<256x64xf32>
    %5 = arith.addf %2, %4 : vector<256x64xf32>
    %cst_5 = arith.constant 0.000000e+00 : f32
    %6 = vector.broadcast %cst_5 : f32 to vector<256x64xf32>
    %7 = arith.maximumf %5, %6 : vector<256x64xf32>
    %c0_6 = arith.constant 0 : index
    %c0_7 = arith.constant 0 : index
    %8 = vector.load %arg4[%c0_6, %c0_7] : memref<64x64xf32, #tpu.memory_space<vmem>>, vector<64x64xf32>
    %cst_8 = arith.constant dense<0.000000e+00> : vector<256x64xf32>
    %9 = tpu.matmul %7, %8, %cst_8 {dimension_numbers = #tpu.dot_dimension_numbers<[1], [0], [0], [1], [0, 0, 1, 1], [], []>} : vector<256x64xf32>, vector<64x64xf32>, vector<256x64xf32> -> vector<256x64xf32>
    %c0_9 = arith.constant 0 : index
    %c0_10 = arith.constant 0 : index
    %10 = vector.load %arg5[%c0_9, %c0_10] : memref<1x64xf32, #tpu.memory_space<vmem>>, vector<1x64xf32>
    %11 = vector.broadcast %10 : vector<1x64xf32> to vector<256x64xf32>
    %12 = arith.addf %9, %11 : vector<256x64xf32>
    %cst_11 = arith.constant 0.000000e+00 : f32
    %13 = vector.broadcast %cst_11 : f32 to vector<256x64xf32>
    %14 = arith.maximumf %12, %13 : vector<256x64xf32>
    %c0_12 = arith.constant 0 : index
    %c0_13 = arith.constant 0 : index
    %15 = vector.load %arg6[%c0_12, %c0_13] : memref<64x131xf32, #tpu.memory_space<vmem>>, vector<64x131xf32>
    %cst_14 = arith.constant dense<0.000000e+00> : vector<256x131xf32>
    %16 = tpu.matmul %14, %15, %cst_14 {dimension_numbers = #tpu.dot_dimension_numbers<[1], [0], [0], [1], [0, 0, 1, 1], [], []>} : vector<256x64xf32>, vector<64x131xf32>, vector<256x131xf32> -> vector<256x131xf32>
    %c0_15 = arith.constant 0 : index
    %c0_16 = arith.constant 0 : index
    %17 = vector.load %arg7[%c0_15, %c0_16] : memref<1x131xf32, #tpu.memory_space<vmem>>, vector<1x131xf32>
    %18 = vector.broadcast %17 : vector<1x131xf32> to vector<256x131xf32>
    %19 = arith.addf %16, %18 : vector<256x131xf32>
    %c0_17 = arith.constant 0 : index
    %c0_18 = arith.constant 0 : index
    %20 = vector.load %arg8[%c0_17, %c0_18] : memref<256x131xf32, #tpu.memory_space<vmem>>, vector<256x131xf32>
    tpu.vector_store %arg8[%c0_17, %c0_18], %19 {strides = array<i32>} : memref<256x131xf32, #tpu.memory_space<vmem>>, vector<256x131xf32>,
    return
  }
  func.func @transform_0(%arg0: i32) -> (i32, i32) {
    %c0_i32 = arith.constant 0 : i32
    %c0_i32_0 = arith.constant 0 : i32
    return %arg0, %c0_i32 : i32, i32
  }
  func.func @transform_1(%arg0: i32) -> (i32, i32) {
    %c0_i32 = arith.constant 0 : i32
    %c0_i32_0 = arith.constant 0 : i32
    %c0_i32_1 = arith.constant 0 : i32
    return %c0_i32, %c0_i32_0 : i32, i32
  }
  func.func @transform_2(%arg0: i32) -> (i32, i32) {
    %c0_i32 = arith.constant 0 : i32
    %c0_i32_0 = arith.constant 0 : i32
    %c0_i32_1 = arith.constant 0 : i32
    return %c0_i32, %c0_i32_0 : i32, i32
  }
  func.func @transform_3(%arg0: i32) -> (i32, i32) {
    %c0_i32 = arith.constant 0 : i32
    %c0_i32_0 = arith.constant 0 : i32
    %c0_i32_1 = arith.constant 0 : i32
    return %c0_i32, %c0_i32_0 : i32, i32
  }
  func.func @transform_4(%arg0: i32) -> (i32, i32) {
    %c0_i32 = arith.constant 0 : i32
    %c0_i32_0 = arith.constant 0 : i32
    %c0_i32_1 = arith.constant 0 : i32
    return %c0_i32, %c0_i32_0 : i32, i32
  }
  func.func @transform_5(%arg0: i32) -> (i32, i32) {
    %c0_i32 = arith.constant 0 : i32
    %c0_i32_0 = arith.constant 0 : i32
    %c0_i32_1 = arith.constant 0 : i32
    return %c0_i32, %c0_i32_0 : i32, i32
  }
  func.func @transform_6(%arg0: i32) -> (i32, i32) {
    %c0_i32 = arith.constant 0 : i32
    %c0_i32_0 = arith.constant 0 : i32
    %c0_i32_1 = arith.constant 0 : i32
    return %c0_i32, %c0_i32_0 : i32, i32
  }
  func.func @transform_7(%arg0: i32) -> (i32, i32) {
    %c0_i32 = arith.constant 0 : i32
    %c0_i32_0 = arith.constant 0 : i32
    return %arg0, %c0_i32 : i32, i32
  }
}

</mosaic_0001>

<bundles_post_ra>
// kernel: tpu_custom_call.1
= control target key start
LH: loop header
LB: loop body
LE: loop exit
PB: predicated region body
PF: predicated region fallthrough
CT: control target
= control target key end

     0   :  { %vm160_vm0 = vcmask 1042432   ;;  %vm63_vm1 = vcmask 23552   ;;  %vm321_vm2 = vcmask 523264   ;;  %s1814_s1 = inlined_call_operand.vmem [shape: f32[3,64], index: 1, kind: input, shape index: {}]   ;;  %s1815_s0 = inlined_call_operand.vmem [shape: f32[256,3], index: 0, kind: input, shape index: {}]   ;;  %s1816_s2 = inlined_call_operand.vmem [shape: f32[1,64], index: 2, kind: input, shape index: {}]   ;;  %s1817_s3 = inlined_call_operand.vmem [shape: f32[64,64], index: 3, kind: input, shape index: {}]   ;;  %s1818_s4 = inlined_call_operand.vmem [shape: f32[1,64], index: 4, kind: input, shape index: {}]   ;;  %s1819_s5 = inlined_call_operand.vmem [shape: f32[64,131], index: 5, kind: input, shape index: {}]   ;;  %s1820_s6 = inlined_call_operand.vmem [shape: f32[1,131], index: 6, kind: input, shape index: {}]   ;;  %s1821_s7 = inlined_call_operand.vmem [shape: f32[256,131], index: 7, kind: output, shape index: {}]  }
   0x1   :  { %v58_v0 = vld [vmem:[%s1814_s1] sm:$0x7]  ;;  %v27_v2 = vld [vmem:[%s1815_s0 + $0x8] sm:$0xff]  ;;  %v28_v3 = vld [vmem:[%s1815_s0 + $0x10] sm:$0xff] }
   0x2   :  { %v26_v1 = vld [vmem:[%s1815_s0] sm:$0xff]  ;;  %975 = vmatpush.msk.msra.mxu0 %vm160_vm0, %v58_v0  ;;  %v29_v4 = vld [vmem:[%s1815_s0 + $0x18] sm:$0xff]  ;;  %v31_v6 = vld [vmem:[%s1815_s0 + $0x28] sm:$0xff] }
   0x3   :  { %976 = vmatmul.msk.f32.vlgmr.msra.gmra.mxu0 %vm63_vm1, %v26_v1  ;;  %v30_v5 = vld [vmem:[%s1815_s0 + $0x20] sm:$0xff]  ;;  %v32_v7 = vld [vmem:[%s1815_s0 + $0x30] sm:$0xff]  ;;  %v33_v8 = vld [vmem:[%s1815_s0 + $0x38] sm:$0xff] }
   0x4   :  { %v34_v9 = vld [vmem:[%s1815_s0 + $0x40] sm:$0xff]  ;;  %v35_v10 = vld [vmem:[%s1815_s0 + $0x48] sm:$0xff]  ;;  %v36_v11 = vld [vmem:[%s1815_s0 + $0x50] sm:$0xff] }
   0x5   :  { %v316_v12 = vld [vmem:[%s1817_s3 + $0x38] sm:$0xff]  ;;  %v315_v13 = vld [vmem:[%s1817_s3 + $0x30] sm:$0xff]  ;;  %v314_v14 = vld [vmem:[%s1817_s3 + $0x28] sm:$0xff] }
   0x6   :  { %426 = vmatpush.msra.mxu1 %v316_v12  ;;  %v37_v15 = vld [vmem:[%s1815_s0 + $0x58] sm:$0xff]  ;;  %v313_v16 = vld [vmem:[%s1817_s3 + $0x20] sm:$0xff]  ;;  %v311_v18 = vld [vmem:[%s1817_s3 + $0x10] sm:$0xff] }
   0x7   :  { %v312_v17 = vld [vmem:[%s1817_s3 + $0x18] sm:$0xff]  ;;  %v38_v19 = vld [vmem:[%s1815_s0 + $0x60] sm:$0xff]  ;;  %v310_v20 = vld [vmem:[%s1817_s3 + $0x8] sm:$0xff] }
   0x8   :  { %427 = vmatpush.msra.mxu1 %v315_v13  ;;  %v309_v21 = vld [vmem:[%s1817_s3] sm:$0xff]  ;;  %v39_v22 = vld [vmem:[%s1815_s0 + $0x68] sm:$0xff]  ;;  %v40_v23 = vld [vmem:[%s1815_s0 + $0x70] sm:$0xff] }
   0x9   :  { %v41_v24 = vld [vmem:[%s1815_s0 + $0x78] sm:$0xff]  ;;  %v1240_v25 = vld [vmem:[%s1816_s2] ss:$0 sm:$0xff]  ;;  %v43_v31 = vld [vmem:[%s1815_s0 + $0x88] sm:$0xff] }
   0xa   :  { %428 = vmatpush.msra.mxu1 %v314_v14  ;;  %v42_v27 = vld [vmem:[%s1815_s0 + $0x80] sm:$0xff]  ;;  %v44_v35 = vld [vmem:[%s1815_s0 + $0x90] sm:$0xff]  ;;  %v45_v39 = vld [vmem:[%s1815_s0 + $0x98] sm:$0xff] }
   0xb   :  { %977 = vmatmul.msk.f32.gmra.mxu0 %vm63_vm1, %v27_v2  ;;  %v46_v43 = vld [vmem:[%s1815_s0 + $0xa0] sm:$0xff]  ;;  %v47_v47 = vld [vmem:[%s1815_s0 + $0xa8] sm:$0xff]  ;;  %v48_v51 = vld [vmem:[%s1815_s0 + $0xb0] sm:$0xff] }
   0xc   :  { %429 = vmatpush.msra.mxu1 %v313_v16  ;;  %v49_v55 = vld [vmem:[%s1815_s0 + $0xb8] sm:$0xff]  ;;  %v50_v59 = vld [vmem:[%s1815_s0 + $0xc0] sm:$0xff]  ;;  %v51_v63 = vld [vmem:[%s1815_s0 + $0xc8] sm:$0xff] }
   0xd   :  { %v576_v12 = vld [vmem:[%s1819_s5 + $0x68] sm:$0xff]  ;;  %v573_v14 = vld [vmem:[%s1819_s5 + $0x50] sm:$0xff]  ;;  %v571_v16 = vld [vmem:[%s1819_s5 + $0x40] sm:$0xff] }
   0xe   :  { %430 = vmatpush.msra.mxu1 %v312_v17  ;;  %v572_v17 = vld [vmem:[%s1819_s5 + $0x48] sm:$0xff] }
  0x10   :  { %431 = vmatpush.msra.mxu1 %v311_v18  ;;  %v569_v18 = vld [vmem:[%s1819_s5 + $0x30] sm:$0xff] }
  0x12   :  { %432 = vmatpush.msra.mxu1 %v310_v20 }
  0x13   :  { %978 = vmatmul.msk.f32.gmra.mxu0 %vm63_vm1, %v28_v3  ;;  %v52_v3 = vld [vmem:[%s1815_s0 + $0xd0] sm:$0xff] }
  0x14   :  { %433 = vmatpush.msra.mxu1 %v309_v21  ;;  %v54_v21 = vld [vmem:[%s1815_s0 + $0xe0] sm:$0xff] }
  0x1b   :  { %979 = vmatmul.msk.f32.gmra.mxu0 %vm63_vm1, %v29_v4 }
  0x23   :  { %980 = vmatmul.msk.f32.gmra.mxu0 %vm63_vm1, %v30_v5 }
  0x2b   :  { %981 = vmatmul.msk.f32.gmra.mxu0 %vm63_vm1, %v31_v6  ;;  %v577_v6 = vld [vmem:[%s1819_s5 + $0x70] sm:$0xff] }
  0x2c   :  { %689 = vmatpush.msra.mxu2 %v577_v6 }
  0x33   :  { %982 = vmatmul.msk.f32.gmra.mxu0 %vm63_vm1, %v32_v7  ;;  %v578_v7 = vld [vmem:[%s1819_s5 + $0x78] sm:$0xff] }
  0x34   :  { %802 = vmatpush.msra.mxu3 %v578_v7 }
  0x36   :  { %803 = vmatpush.msra.mxu3 %v576_v12 }
  0x3b   :  { %983 = vmatmul.msk.f32.gmra.mxu0 %vm63_vm1, %v33_v8 }
  0x43   :  { %984 = vmatmul.msk.f32.gmra.mxu0 %vm63_vm1, %v34_v9  ;;  %v53_v9 = vld [vmem:[%s1815_s0 + $0xd8] sm:$0xff] }
  0x4b   :  { %985 = vmatmul.msk.f32.gmra.mxu0 %vm63_vm1, %v35_v10 }
  0x53   :  { %986 = vmatmul.msk.f32.gmra.mxu0 %vm63_vm1, %v36_v11  ;;  %v575_v11 = vld [vmem:[%s1819_s5 + $0x60] sm:$0xff] }
  0x54   :  { %690 = vmatpush.msra.mxu2 %v575_v11 }
  0x56   :  { %691 = vmatpush.msra.mxu2 %v573_v14 }
  0x58   :  { %692 = vmatpush.msra.mxu2 %v571_v16 }
  0x5a   :  { %693 = vmatpush.msra.mxu2 %v569_v18 }
  0x5b   :  { %987 = vmatmul.msk.f32.gmra.mxu0 %vm63_vm1, %v37_v15  ;;  %v574_v15 = vld [vmem:[%s1819_s5 + $0x58] sm:$0xff] }
  0x5c   :  { %804 = vmatpush.msra.mxu3 %v574_v15 }
  0x5e   :  { %805 = vmatpush.msra.mxu3 %v572_v17 }
  0x63   :  { %988 = vmatmul.msk.f32.gmra.mxu0 %vm63_vm1, %v38_v19  ;;  %v570_v19 = vld [vmem:[%s1819_s5 + $0x38] sm:$0xff] }
  0x64   :  { %806 = vmatpush.msra.mxu3 %v570_v19 }
  0x6b   :  { %989 = vmatmul.msk.f32.gmra.mxu0 %vm63_vm1, %v39_v22 }
  0x73   :  { %990 = vmatmul.msk.f32.gmra.mxu0 %vm63_vm1, %v40_v23  ;;  %v567_v23 = vld [vmem:[%s1819_s5 + $0x20] sm:$0xff] }
  0x74   :  { %694 = vmatpush.msra.mxu2 %v567_v23 }
  0x7b   :  { %991 = vmatmul.msk.f32.gmra.mxu0 %vm63_vm1, %v41_v24  ;;  %v568_v24 = vld [vmem:[%s1819_s5 + $0x28] sm:$0xff] }
  0x7c   :  { %807 = vmatpush.msra.mxu3 %v568_v24 }
  0x80   :  { %v181_v26 = vpop.f32.mrf.mxu0 }
  0x81   :  { %v182_v28 = vadd.f32 %v1240_v25, %v181_v26 }
  0x83   :  { %v277_v29 = vmax.f32 %v182_v28, 0.0  ;;  %992 = vmatmul.msk.f32.gmra.mxu0 %vm63_vm1, %v42_v27  ;;  %v565_v27 = vld [vmem:[%s1819_s5 + $0x10] sm:$0xff]  ;;  %v566_v28 = vld [vmem:[%s1819_s5 + $0x18] sm:$0xff] }
  0x84   :  { %695 = vmatpush.msra.mxu2 %v565_v27  ;;  %808 = vmatpush.msra.mxu3 %v566_v28 }
  0x85   :  { %1008 = vmatmul.msk.f32.vlgmr.msra.gmra.mxu1 %vm321_vm2, %v277_v29  ;;  %v563_v29 = vld [vmem:[%s1819_s5] sm:$0xff] }
  0x86   :  { %696 = vmatpush.msra.mxu2 %v563_v29 }
  0x88   :  { %v184_v30 = vpop.f32.mrf.mxu0 }
  0x89   :  { %v185_v32 = vadd.f32 %v1240_v25, %v184_v30  ;;  %v564_v30 = vld [vmem:[%s1819_s5 + $0x8] sm:$0xff] }
  0x8a   :  { %809 = vmatpush.msra.mxu3 %v564_v30 }
  0x8b   :  { %v278_v33 = vmax.f32 %v185_v32, 0.0  ;;  %993 = vmatmul.msk.f32.gmra.mxu0 %vm63_vm1, %v43_v31  ;;  %v55_v32 = vld [vmem:[%s1815_s0 + $0xe8] sm:$0xff] }
  0x8d   :  { %1009 = vmatmul.msk.f32.gmra.mxu1 %vm321_vm2, %v278_v33 }
  0x90   :  { %v187_v34 = vpop.f32.mrf.mxu0 }
  0x91   :  { %v188_v36 = vadd.f32 %v1240_v25, %v187_v34 }
  0x93   :  { %v279_v37 = vmax.f32 %v188_v36, 0.0  ;;  %994 = vmatmul.msk.f32.gmra.mxu0 %vm63_vm1, %v44_v35  ;;  %v56_v36 = vld [vmem:[%s1815_s0 + $0xf0] sm:$0xff] }
  0x95   :  { %1010 = vmatmul.msk.f32.gmra.mxu1 %vm321_vm2, %v279_v37 }
  0x98   :  { %v190_v38 = vpop.f32.mrf.mxu0 }
  0x99   :  { %v191_v40 = vadd.f32 %v1240_v25, %v190_v38 }
  0x9b   :  { %v280_v41 = vmax.f32 %v191_v40, 0.0  ;;  %995 = vmatmul.msk.f32.gmra.mxu0 %vm63_vm1, %v45_v39  ;;  %v57_v40 = vld [vmem:[%s1815_s0 + $0xf8] sm:$0xff] }
  0x9d   :  { %1011 = vmatmul.msk.f32.gmra.mxu1 %vm321_vm2, %v280_v41 }
  0xa0   :  { %v193_v42 = vpop.f32.mrf.mxu0 }
  0xa1   :  { %v194_v44 = vadd.f32 %v1240_v25, %v193_v42 }
  0xa3   :  { %v281_v45 = vmax.f32 %v194_v44, 0.0  ;;  %996 = vmatmul.msk.f32.gmra.mxu0 %vm63_vm1, %v46_v43  ;;  %v1389_v43 = vld [vmem:[%s1818_s4] ss:$0 sm:$0xff] }
  0xa5   :  { %1012 = vmatmul.msk.f32.gmra.mxu1 %vm321_vm2, %v281_v45 }
  0xa8   :  { %v196_v46 = vpop.f32.mrf.mxu0 }
  0xa9   :  { %v197_v48 = vadd.f32 %v1240_v25, %v196_v46 }
  0xab   :  { %v282_v49 = vmax.f32 %v197_v48, 0.0  ;;  %997 = vmatmul.msk.f32.gmra.mxu0 %vm63_vm1, %v47_v47 }
  0xad   :  { %1013 = vmatmul.msk.f32.gmra.mxu1 %vm321_vm2, %v282_v49 }
  0xb0   :  { %v199_v50 = vpop.f32.mrf.mxu0 }
  0xb1   :  { %v200_v52 = vadd.f32 %v1240_v25, %v199_v50 }
  0xb3   :  { %v283_v53 = vmax.f32 %v200_v52, 0.0  ;;  %998 = vmatmul.msk.f32.gmra.mxu0 %vm63_vm1, %v48_v51 }
  0xb5   :  { %1014 = vmatmul.msk.f32.gmra.mxu1 %vm321_vm2, %v283_v53 }
  0xb8   :  { %v202_v54 = vpop.f32.mrf.mxu0 }
  0xb9   :  { %v203_v56 = vadd.f32 %v1240_v25, %v202_v54 }
  0xbb   :  { %v284_v57 = vmax.f32 %v203_v56, 0.0  ;;  %999 = vmatmul.msk.f32.gmra.mxu0 %vm63_vm1, %v49_v55 }
  0xbd   :  { %1015 = vmatmul.msk.f32.gmra.mxu1 %vm321_vm2, %v284_v57 }
  0xc0   :  { %v205_v58 = vpop.f32.mrf.mxu0 }
  0xc1   :  { %v206_v60 = vadd.f32 %v1240_v25, %v205_v58 }
  0xc3   :  { %v285_v61 = vmax.f32 %v206_v60, 0.0  ;;  %1000 = vmatmul.msk.f32.gmra.mxu0 %vm63_vm1, %v50_v59 }
  0xc5   :  { %1016 = vmatmul.msk.f32.gmra.mxu1 %vm321_vm2, %v285_v61 }
  0xc8   :  { %v208_v62 = vpop.f32.mrf.mxu0 }
  0xc9   :  { %v209_v0 = vadd.f32 %v1240_v25, %v208_v62 }
  0xcb   :  { %v286_v1 = vmax.f32 %v209_v0, 0.0  ;;  %1001 = vmatmul.msk.f32.gmra.mxu0 %vm63_vm1, %v51_v63 }
  0xcd   :  { %1017 = vmatmul.msk.f32.gmra.mxu1 %vm321_vm2, %v286_v1 }
  0xd0   :  { %v211_v2 = vpop.f32.mrf.mxu0 }
  0xd1   :  { %v212_v4 = vadd.f32 %v1240_v25, %v211_v2 }
  0xd3   :  { %v287_v5 = vmax.f32 %v212_v4, 0.0  ;;  %1002 = vmatmul.msk.f32.gmra.mxu0 %vm63_vm1, %v52_v3 }
  0xd5   :  { %1018 = vmatmul.msk.f32.gmra.mxu1 %vm321_vm2, %v287_v5 }
  0xd8   :  { %v214_v8 = vpop.f32.mrf.mxu0 }
  0xd9   :  { %v215_v10 = vadd.f32 %v1240_v25, %v214_v8 }
  0xdb   :  { %v288_v13 = vmax.f32 %v215_v10, 0.0  ;;  %1003 = vmatmul.msk.f32.gmra.mxu0 %vm63_vm1, %v53_v9 }
  0xdd   :  { %1019 = vmatmul.msk.f32.gmra.mxu1 %vm321_vm2, %v288_v13 }
  0xe0   :  { %v217_v20 = vpop.f32.mrf.mxu0 }
  0xe1   :  { %v218_v22 = vadd.f32 %v1240_v25, %v217_v20 }
  0xe3   :  { %v289_v26 = vmax.f32 %v218_v22, 0.0  ;;  %1004 = vmatmul.msk.f32.gmra.mxu0 %vm63_vm1, %v54_v21 }
  0xe5   :  { %1020 = vmatmul.msk.f32.gmra.mxu1 %vm321_vm2, %v289_v26 }
  0xe8   :  { %v220_v31 = vpop.f32.mrf.mxu0 }
  0xe9   :  { %v221_v33 = vadd.f32 %v1240_v25, %v220_v31 }
  0xeb   :  { %v290_v34 = vmax.f32 %v221_v33, 0.0  ;;  %1005 = vmatmul.msk.f32.gmra.mxu0 %vm63_vm1, %v55_v32 }
  0xed   :  { %1021 = vmatmul.msk.f32.gmra.mxu1 %vm321_vm2, %v290_v34 }
  0xf0   :  { %v223_v35 = vpop.f32.mrf.mxu0 }
  0xf1   :  { %v224_v37 = vadd.f32 %v1240_v25, %v223_v35 }
  0xf3   :  { %v291_v38 = vmax.f32 %v224_v37, 0.0  ;;  %1006 = vmatmul.msk.f32.gmra.mxu0 %vm63_vm1, %v56_v36 }
  0xf5   :  { %1022 = vmatmul.msk.f32.gmra.mxu1 %vm321_vm2, %v291_v38 }
  0xf8   :  { %v226_v39 = vpop.f32.mrf.mxu0 }
  0xf9   :  { %v227_v41 = vadd.f32 %v1240_v25, %v226_v39 }
  0xfb   :  { %v292_v42 = vmax.f32 %v227_v41, 0.0  ;;  %1007 = vmatmul.msk.f32.gmra.mxu0 %vm63_vm1, %v57_v40 }
  0xfd   :  { %1023 = vmatmul.msk.f32.gmra.mxu1 %vm321_vm2, %v292_v42 }
 0x100   :  { %v229_v44 = vpop.f32.mrf.mxu0 }
 0x101   :  { %v230_v45 = vadd.f32 %v1240_v25, %v229_v44 }
 0x102   :  { %v435_v46 = vpop.f32.mrf.mxu1 }
 0x103   :  { %v293_v47 = vmax.f32 %v230_v45, 0.0  ;;  %v436_v48 = vadd.f32 %v1389_v43, %v435_v46 }
 0x105   :  { %v531_v49 = vmax.f32 %v436_v48, 0.0  ;;  %1024 = vmatmul.msk.f32.gmra.mxu1 %vm321_vm2, %v293_v47 }
 0x107   :  { %1040 = vmatmul.msk.f32.vlgmr.msra.gmra.mxu2 %vm321_vm2, %v531_v49  ;;  %1072 = vmatmul.msk.f32.vlgmr.msra.gmra.mxu3 %vm321_vm2, %v531_v49 }
 0x108   :  { %v232_v50 = vpop.f32.mrf.mxu0 }
 0x109   :  { %v233_v51 = vadd.f32 %v1240_v25, %v232_v50 }
 0x10a   :  { %v438_v52 = vpop.f32.mrf.mxu1 }
 0x10b   :  { %v294_v53 = vmax.f32 %v233_v51, 0.0  ;;  %v439_v54 = vadd.f32 %v1389_v43, %v438_v52 }
 0x10d   :  { %v532_v55 = vmax.f32 %v439_v54, 0.0  ;;  %1025 = vmatmul.msk.f32.gmra.mxu1 %vm321_vm2, %v294_v53 }
 0x10f   :  { %1041 = vmatmul.msk.f32.gmra.mxu2 %vm321_vm2, %v532_v55  ;;  %1073 = vmatmul.msk.f32.gmra.mxu3 %vm321_vm2, %v532_v55 }
 0x110   :  { %v235_v56 = vpop.f32.mrf.mxu0 }
 0x111   :  { %v236_v57 = vadd.f32 %v1240_v25, %v235_v56 }
 0x112   :  { %v441_v58 = vpop.f32.mrf.mxu1 }
 0x113   :  { %v295_v59 = vmax.f32 %v236_v57, 0.0  ;;  %v442_v60 = vadd.f32 %v1389_v43, %v441_v58 }
 0x115   :  { %v533_v61 = vmax.f32 %v442_v60, 0.0  ;;  %1026 = vmatmul.msk.f32.gmra.mxu1 %vm321_vm2, %v295_v59 }
 0x117   :  { %1042 = vmatmul.msk.f32.gmra.mxu2 %vm321_vm2, %v533_v61  ;;  %1074 = vmatmul.msk.f32.gmra.mxu3 %vm321_vm2, %v533_v61 }
 0x118   :  { %v238_v62 = vpop.f32.mrf.mxu0 }
 0x119   :  { %v239_v63 = vadd.f32 %v1240_v25, %v238_v62 }
 0x11a   :  { %v444_v0 = vpop.f32.mrf.mxu1 }
 0x11b   :  { %v296_v1 = vmax.f32 %v239_v63, 0.0  ;;  %v445_v2 = vadd.f32 %v1389_v43, %v444_v0 }
 0x11d   :  { %v534_v3 = vmax.f32 %v445_v2, 0.0  ;;  %1027 = vmatmul.msk.f32.gmra.mxu1 %vm321_vm2, %v296_v1 }
 0x11f   :  { %1043 = vmatmul.msk.f32.gmra.mxu2 %vm321_vm2, %v534_v3  ;;  %1075 = vmatmul.msk.f32.gmra.mxu3 %vm321_vm2, %v534_v3 }
 0x120   :  { %v241_v4 = vpop.f32.mrf.mxu0 }
 0x121   :  { %v242_v5 = vadd.f32 %v1240_v25, %v241_v4 }
 0x122   :  { %v447_v6 = vpop.f32.mrf.mxu1 }
 0x123   :  { %v297_v7 = vmax.f32 %v242_v5, 0.0  ;;  %v448_v8 = vadd.f32 %v1389_v43, %v447_v6 }
 0x125   :  { %v535_v9 = vmax.f32 %v448_v8, 0.0  ;;  %1028 = vmatmul.msk.f32.gmra.mxu1 %vm321_vm2, %v297_v7 }
 0x127   :  { %1044 = vmatmul.msk.f32.gmra.mxu2 %vm321_vm2, %v535_v9  ;;  %1076 = vmatmul.msk.f32.gmra.mxu3 %vm321_vm2, %v535_v9 }
 0x128   :  { %v244_v10 = vpop.f32.mrf.mxu0 }
 0x129   :  { %v245_v11 = vadd.f32 %v1240_v25, %v244_v10 }
 0x12a   :  { %v450_v12 = vpop.f32.mrf.mxu1 }
 0x12b   :  { %v298_v13 = vmax.f32 %v245_v11, 0.0  ;;  %v451_v14 = vadd.f32 %v1389_v43, %v450_v12 }
 0x12d   :  { %v536_v15 = vmax.f32 %v451_v14, 0.0  ;;  %1029 = vmatmul.msk.f32.gmra.mxu1 %vm321_vm2, %v298_v13 }
 0x12f   :  { %1045 = vmatmul.msk.f32.gmra.mxu2 %vm321_vm2, %v536_v15  ;;  %1077 = vmatmul.msk.f32.gmra.mxu3 %vm321_vm2, %v536_v15 }
 0x130   :  { %v247_v16 = vpop.f32.mrf.mxu0 }
 0x131   :  { %v248_v17 = vadd.f32 %v1240_v25, %v247_v16  ;;  %v579_v16 = vld [vmem:[%s1820_s6] sm:$0x3] }
 0x132   :  { %v453_v18 = vpop.f32.mrf.mxu1 }
 0x133   :  { %v299_v19 = vmax.f32 %v248_v17, 0.0  ;;  %v454_v20 = vadd.f32 %v1389_v43, %v453_v18  ;;  %v1479_v18 = vperm.slane %v579_v16, 1 }
 0x135   :  { %v537_v21 = vmax.f32 %v454_v20, 0.0  ;;  %1030 = vmatmul.msk.f32.gmra.mxu1 %vm321_vm2, %v299_v19 }
 0x137   :  { %1046 = vmatmul.msk.f32.gmra.mxu2 %vm321_vm2, %v537_v21  ;;  %1078 = vmatmul.msk.f32.gmra.mxu3 %vm321_vm2, %v537_v21 }
 0x138   :  { %v250_v22 = vpop.f32.mrf.mxu0 }
 0x139   :  { %v251_v23 = vadd.f32 %v1240_v25, %v250_v22 }
 0x13a   :  { %v456_v24 = vpop.f32.mrf.mxu1 }
 0x13b   :  { %v300_v26 = vmax.f32 %v251_v23, 0.0  ;;  %v457_v27 = vadd.f32 %v1389_v43, %v456_v24 }
 0x13d   :  { %v538_v28 = vmax.f32 %v457_v27, 0.0  ;;  %1031 = vmatmul.msk.f32.gmra.mxu1 %vm321_vm2, %v300_v26 }
 0x13f   :  { %1047 = vmatmul.msk.f32.gmra.mxu2 %vm321_vm2, %v538_v28  ;;  %1079 = vmatmul.msk.f32.gmra.mxu3 %vm321_vm2, %v538_v28 }
 0x140   :  { %v253_v29 = vpop.f32.mrf.mxu0 }
 0x141   :  { %v254_v30 = vadd.f32 %v1240_v25, %v253_v29 }
 0x142   :  { %v459_v31 = vpop.f32.mrf.mxu1 }
 0x143   :  { %v301_v32 = vmax.f32 %v254_v30, 0.0  ;;  %v460_v33 = vadd.f32 %v1389_v43, %v459_v31 }
 0x145   :  { %v539_v34 = vmax.f32 %v460_v33, 0.0  ;;  %1032 = vmatmul.msk.f32.gmra.mxu1 %vm321_vm2, %v301_v32 }
 0x147   :  { %1048 = vmatmul.msk.f32.gmra.mxu2 %vm321_vm2, %v539_v34  ;;  %1080 = vmatmul.msk.f32.gmra.mxu3 %vm321_vm2, %v539_v34 }
 0x148   :  { %v256_v35 = vpop.f32.mrf.mxu0 }
 0x149   :  { %v257_v36 = vadd.f32 %v1240_v25, %v256_v35 }
 0x14a   :  { %v462_v37 = vpop.f32.mrf.mxu1 }
 0x14b   :  { %v302_v38 = vmax.f32 %v257_v36, 0.0  ;;  %v463_v39 = vadd.f32 %v1389_v43, %v462_v37 }
 0x14d   :  { %v540_v40 = vmax.f32 %v463_v39, 0.0  ;;  %1033 = vmatmul.msk.f32.gmra.mxu1 %vm321_vm2, %v302_v38 }
 0x14f   :  { %1049 = vmatmul.msk.f32.gmra.mxu2 %vm321_vm2, %v540_v40  ;;  %1081 = vmatmul.msk.f32.gmra.mxu3 %vm321_vm2, %v540_v40 }
 0x150   :  { %v259_v41 = vpop.f32.mrf.mxu0 }
 0x151   :  { %v260_v42 = vadd.f32 %v1240_v25, %v259_v41 }
 0x152   :  { %v465_v44 = vpop.f32.mrf.mxu1 }
 0x153   :  { %v303_v45 = vmax.f32 %v260_v42, 0.0  ;;  %v466_v46 = vadd.f32 %v1389_v43, %v465_v44 }
 0x155   :  { %v541_v47 = vmax.f32 %v466_v46, 0.0  ;;  %1034 = vmatmul.msk.f32.gmra.mxu1 %vm321_vm2, %v303_v45 }
 0x157   :  { %1050 = vmatmul.msk.f32.gmra.mxu2 %vm321_vm2, %v541_v47  ;;  %1082 = vmatmul.msk.f32.gmra.mxu3 %vm321_vm2, %v541_v47 }
 0x158   :  { %v262_v48 = vpop.f32.mrf.mxu0 }
 0x159   :  { %v263_v49 = vadd.f32 %v1240_v25, %v262_v48 }
 0x15a   :  { %v468_v50 = vpop.f32.mrf.mxu1 }
 0x15b   :  { %v304_v51 = vmax.f32 %v263_v49, 0.0  ;;  %v469_v52 = vadd.f32 %v1389_v43, %v468_v50 }
 0x15d   :  { %v542_v53 = vmax.f32 %v469_v52, 0.0  ;;  %1035 = vmatmul.msk.f32.gmra.mxu1 %vm321_vm2, %v304_v51 }
 0x15f   :  { %1051 = vmatmul.msk.f32.gmra.mxu2 %vm321_vm2, %v542_v53  ;;  %1083 = vmatmul.msk.f32.gmra.mxu3 %vm321_vm2, %v542_v53 }
 0x160   :  { %v265_v54 = vpop.f32.mrf.mxu0 }
 0x161   :  { %v266_v55 = vadd.f32 %v1240_v25, %v265_v54 }
 0x162   :  { %v471_v56 = vpop.f32.mrf.mxu1 }
 0x163   :  { %v305_v57 = vmax.f32 %v266_v55, 0.0  ;;  %v472_v58 = vadd.f32 %v1389_v43, %v471_v56 }
 0x165   :  { %v543_v59 = vmax.f32 %v472_v58, 0.0  ;;  %1036 = vmatmul.msk.f32.gmra.mxu1 %vm321_vm2, %v305_v57 }
 0x167   :  { %1052 = vmatmul.msk.f32.gmra.mxu2 %vm321_vm2, %v543_v59  ;;  %1084 = vmatmul.msk.f32.gmra.mxu3 %vm321_vm2, %v543_v59 }
 0x168   :  { %v268_v60 = vpop.f32.mrf.mxu0 }
 0x169   :  { %v269_v61 = vadd.f32 %v1240_v25, %v268_v60 }
 0x16a   :  { %v474_v62 = vpop.f32.mrf.mxu1 }
 0x16b   :  { %v306_v63 = vmax.f32 %v269_v61, 0.0  ;;  %v475_v0 = vadd.f32 %v1389_v43, %v474_v62 }
 0x16d   :  { %v544_v1 = vmax.f32 %v475_v0, 0.0  ;;  %1037 = vmatmul.msk.f32.gmra.mxu1 %vm321_vm2, %v306_v63 }
 0x16f   :  { %1053 = vmatmul.msk.f32.gmra.mxu2 %vm321_vm2, %v544_v1  ;;  %1085 = vmatmul.msk.f32.gmra.mxu3 %vm321_vm2, %v544_v1 }
 0x170   :  { %v271_v2 = vpop.f32.mrf.mxu0 }
 0x171   :  { %v272_v3 = vadd.f32 %v1240_v25, %v271_v2 }
 0x172   :  { %v477_v4 = vpop.f32.mrf.mxu1 }
 0x173   :  { %v307_v5 = vmax.f32 %v272_v3, 0.0  ;;  %v478_v6 = vadd.f32 %v1389_v43, %v477_v4 }
 0x175   :  { %v545_v7 = vmax.f32 %v478_v6, 0.0  ;;  %1038 = vmatmul.msk.f32.gmra.mxu1 %vm321_vm2, %v307_v5 }
 0x177   :  { %1054 = vmatmul.msk.f32.gmra.mxu2 %vm321_vm2, %v545_v7  ;;  %1086 = vmatmul.msk.f32.gmra.mxu3 %vm321_vm2, %v545_v7 }
 0x178   :  { %v274_v8 = vpop.f32.mrf.mxu0 }
 0x179   :  { %v275_v9 = vadd.f32 %v1240_v25, %v274_v8  ;;  %v1477_v25 = vperm.slane %v579_v16, 0 }
 0x17a   :  { %v480_v10 = vpop.f32.mrf.mxu1 }
 0x17b   :  { %v308_v11 = vmax.f32 %v275_v9, 0.0  ;;  %v481_v12 = vadd.f32 %v1389_v43, %v480_v10 }
 0x17d   :  { %v546_v13 = vmax.f32 %v481_v12, 0.0  ;;  %1039 = vmatmul.msk.f32.gmra.mxu1 %vm321_vm2, %v308_v11 }
 0x17f   :  { %1055 = vmatmul.msk.f32.gmra.mxu2 %vm321_vm2, %v546_v13  ;;  %1087 = vmatmul.msk.f32.gmra.mxu3 %vm321_vm2, %v546_v13 }
 0x182   :  { %v483_v14 = vpop.f32.mrf.mxu1 }
 0x183   :  { %v484_v15 = vadd.f32 %v1389_v43, %v483_v14 }
 0x185   :  { %v547_v17 = vmax.f32 %v484_v15, 0.0 }
 0x187   :  { %1056 = vmatmul.msk.f32.gmra.mxu2 %vm321_vm2, %v547_v17  ;;  %1088 = vmatmul.msk.f32.gmra.mxu3 %vm321_vm2, %v547_v17 }
 0x18a   :  { %v486_v19 = vpop.f32.mrf.mxu1  ;;  %v698_v20 = vpop.f32.mrf.mxu2 }
 0x18b   :  { %v487_v21 = vadd.f32 %v1389_v43, %v486_v19  ;;  %v699_v22 = vadd.f32 %v698_v20, %v1477_v25  ;;  %v811_v23 = vpop.f32.mrf.mxu3 }
 0x18c   :  { %v812_v24 = vadd.f32 %v811_v23, %v1479_v18 }
 0x18d   :  { %v548_v26 = vmax.f32 %v487_v21, 0.0  ;;  %907 = vst [vmem:[%s1821_s7] sm:$0xff] %v699_v22 }
 0x18e   :  { %908 = vst.msk [vmem:[%s1821_s7 + $0x8] sm:$0xff] %vm63_vm1, %v812_v24 }
 0x18f   :  { %1057 = vmatmul.msk.f32.gmra.mxu2 %vm321_vm2, %v548_v26  ;;  %1089 = vmatmul.msk.f32.gmra.mxu3 %vm321_vm2, %v548_v26 }
 0x192   :  { %v489_v27 = vpop.f32.mrf.mxu1  ;;  %v701_v28 = vpop.f32.mrf.mxu2 }
 0x193   :  { %v490_v29 = vadd.f32 %v1389_v43, %v489_v27  ;;  %v702_v30 = vadd.f32 %v701_v28, %v1477_v25  ;;  %v814_v31 = vpop.f32.mrf.mxu3 }
 0x194   :  { %v815_v32 = vadd.f32 %v814_v31, %v1479_v18 }
 0x195   :  { %v549_v33 = vmax.f32 %v490_v29, 0.0  ;;  %909 = vst [vmem:[%s1821_s7 + $0x10] sm:$0xff] %v702_v30 }
 0x196   :  { %910 = vst.msk [vmem:[%s1821_s7 + $0x18] sm:$0xff] %vm63_vm1, %v815_v32 }
 0x197   :  { %1058 = vmatmul.msk.f32.gmra.mxu2 %vm321_vm2, %v549_v33  ;;  %1090 = vmatmul.msk.f32.gmra.mxu3 %vm321_vm2, %v549_v33 }
 0x19a   :  { %v492_v34 = vpop.f32.mrf.mxu1  ;;  %v704_v35 = vpop.f32.mrf.mxu2 }
 0x19b   :  { %v493_v36 = vadd.f32 %v1389_v43, %v492_v34  ;;  %v705_v37 = vadd.f32 %v704_v35, %v1477_v25  ;;  %v817_v38 = vpop.f32.mrf.mxu3 }
 0x19c   :  { %v818_v39 = vadd.f32 %v817_v38, %v1479_v18 }
 0x19d   :  { %v550_v40 = vmax.f32 %v493_v36, 0.0  ;;  %911 = vst [vmem:[%s1821_s7 + $0x20] sm:$0xff] %v705_v37 }
 0x19e   :  { %912 = vst.msk [vmem:[%s1821_s7 + $0x28] sm:$0xff] %vm63_vm1, %v818_v39 }
 0x19f   :  { %1059 = vmatmul.msk.f32.gmra.mxu2 %vm321_vm2, %v550_v40  ;;  %1091 = vmatmul.msk.f32.gmra.mxu3 %vm321_vm2, %v550_v40 }
 0x1a2   :  { %v495_v41 = vpop.f32.mrf.mxu1  ;;  %v707_v42 = vpop.f32.mrf.mxu2 }
 0x1a3   :  { %v496_v44 = vadd.f32 %v1389_v43, %v495_v41  ;;  %v708_v45 = vadd.f32 %v707_v42, %v1477_v25  ;;  %v820_v46 = vpop.f32.mrf.mxu3 }
 0x1a4   :  { %v821_v47 = vadd.f32 %v820_v46, %v1479_v18 }
 0x1a5   :  { %v551_v48 = vmax.f32 %v496_v44, 0.0  ;;  %913 = vst [vmem:[%s1821_s7 + $0x30] sm:$0xff] %v708_v45 }
 0x1a6   :  { %914 = vst.msk [vmem:[%s1821_s7 + $0x38] sm:$0xff] %vm63_vm1, %v821_v47 }
 0x1a7   :  { %1060 = vmatmul.msk.f32.gmra.mxu2 %vm321_vm2, %v551_v48  ;;  %1092 = vmatmul.msk.f32.gmra.mxu3 %vm321_vm2, %v551_v48 }
 0x1aa   :  { %v498_v49 = vpop.f32.mrf.mxu1  ;;  %v710_v50 = vpop.f32.mrf.mxu2 }
 0x1ab   :  { %v499_v51 = vadd.f32 %v1389_v43, %v498_v49  ;;  %v711_v52 = vadd.f32 %v710_v50, %v1477_v25  ;;  %v823_v53 = vpop.f32.mrf.mxu3 }
 0x1ac   :  { %v824_v54 = vadd.f32 %v823_v53, %v1479_v18 }
 0x1ad   :  { %v552_v55 = vmax.f32 %v499_v51, 0.0  ;;  %915 = vst [vmem:[%s1821_s7 + $0x40] sm:$0xff] %v711_v52 }
 0x1ae   :  { %916 = vst.msk [vmem:[%s1821_s7 + $0x48] sm:$0xff] %vm63_vm1, %v824_v54 }
 0x1af   :  { %1061 = vmatmul.msk.f32.gmra.mxu2 %vm321_vm2, %v552_v55  ;;  %1093 = vmatmul.msk.f32.gmra.mxu3 %vm321_vm2, %v552_v55 }
 0x1b2   :  { %v501_v56 = vpop.f32.mrf.mxu1  ;;  %v713_v57 = vpop.f32.mrf.mxu2 }
 0x1b3   :  { %v502_v58 = vadd.f32 %v1389_v43, %v501_v56  ;;  %v714_v59 = vadd.f32 %v713_v57, %v1477_v25  ;;  %v826_v60 = vpop.f32.mrf.mxu3 }
 0x1b4   :  { %v827_v61 = vadd.f32 %v826_v60, %v1479_v18 }
 0x1b5   :  { %v553_v62 = vmax.f32 %v502_v58, 0.0  ;;  %917 = vst [vmem:[%s1821_s7 + $0x50] sm:$0xff] %v714_v59 }
 0x1b6   :  { %918 = vst.msk [vmem:[%s1821_s7 + $0x58] sm:$0xff] %vm63_vm1, %v827_v61 }
 0x1b7   :  { %1062 = vmatmul.msk.f32.gmra.mxu2 %vm321_vm2, %v553_v62  ;;  %1094 = vmatmul.msk.f32.gmra.mxu3 %vm321_vm2, %v553_v62 }
 0x1ba   :  { %v504_v63 = vpop.f32.mrf.mxu1  ;;  %v716_v0 = vpop.f32.mrf.mxu2 }
 0x1bb   :  { %v505_v1 = vadd.f32 %v1389_v43, %v504_v63  ;;  %v717_v2 = vadd.f32 %v716_v0, %v1477_v25  ;;  %v829_v3 = vpop.f32.mrf.mxu3 }
 0x1bc   :  { %v830_v4 = vadd.f32 %v829_v3, %v1479_v18 }
 0x1bd   :  { %v554_v5 = vmax.f32 %v505_v1, 0.0  ;;  %919 = vst [vmem:[%s1821_s7 + $0x60] sm:$0xff] %v717_v2 }
 0x1be   :  { %920 = vst.msk [vmem:[%s1821_s7 + $0x68] sm:$0xff] %vm63_vm1, %v830_v4 }
 0x1bf   :  { %1063 = vmatmul.msk.f32.gmra.mxu2 %vm321_vm2, %v554_v5  ;;  %1095 = vmatmul.msk.f32.gmra.mxu3 %vm321_vm2, %v554_v5 }
 0x1c2   :  { %v507_v6 = vpop.f32.mrf.mxu1  ;;  %v719_v7 = vpop.f32.mrf.mxu2 }
 0x1c3   :  { %v508_v8 = vadd.f32 %v1389_v43, %v507_v6  ;;  %v720_v9 = vadd.f32 %v719_v7, %v1477_v25  ;;  %v832_v10 = vpop.f32.mrf.mxu3 }
 0x1c4   :  { %v833_v11 = vadd.f32 %v832_v10, %v1479_v18 }
 0x1c5   :  { %v555_v12 = vmax.f32 %v508_v8, 0.0  ;;  %921 = vst [vmem:[%s1821_s7 + $0x70] sm:$0xff] %v720_v9 }
 0x1c6   :  { %922 = vst.msk [vmem:[%s1821_s7 + $0x78] sm:$0xff] %vm63_vm1, %v833_v11 }
 0x1c7   :  { %1064 = vmatmul.msk.f32.gmra.mxu2 %vm321_vm2, %v555_v12  ;;  %1096 = vmatmul.msk.f32.gmra.mxu3 %vm321_vm2, %v555_v12 }
 0x1ca   :  { %v510_v13 = vpop.f32.mrf.mxu1  ;;  %v722_v14 = vpop.f32.mrf.mxu2 }
 0x1cb   :  { %v511_v15 = vadd.f32 %v1389_v43, %v510_v13  ;;  %v723_v16 = vadd.f32 %v722_v14, %v1477_v25  ;;  %v835_v17 = vpop.f32.mrf.mxu3 }
 0x1cc   :  { %v836_v19 = vadd.f32 %v835_v17, %v1479_v18 }
 0x1cd   :  { %v556_v20 = vmax.f32 %v511_v15, 0.0  ;;  %923 = vst [vmem:[%s1821_s7 + $0x80] sm:$0xff] %v723_v16 }
 0x1ce   :  { %924 = vst.msk [vmem:[%s1821_s7 + $0x88] sm:$0xff] %vm63_vm1, %v836_v19 }
 0x1cf   :  { %1065 = vmatmul.msk.f32.gmra.mxu2 %vm321_vm2, %v556_v20  ;;  %1097 = vmatmul.msk.f32.gmra.mxu3 %vm321_vm2, %v556_v20 }
 0x1d2   :  { %v513_v21 = vpop.f32.mrf.mxu1  ;;  %v725_v22 = vpop.f32.mrf.mxu2 }
 0x1d3   :  { %v514_v23 = vadd.f32 %v1389_v43, %v513_v21  ;;  %v726_v24 = vadd.f32 %v725_v22, %v1477_v25  ;;  %v838_v26 = vpop.f32.mrf.mxu3 }
 0x1d4   :  { %v839_v27 = vadd.f32 %v838_v26, %v1479_v18 }
 0x1d5   :  { %v557_v28 = vmax.f32 %v514_v23, 0.0  ;;  %925 = vst [vmem:[%s1821_s7 + $0x90] sm:$0xff] %v726_v24 }
 0x1d6   :  { %926 = vst.msk [vmem:[%s1821_s7 + $0x98] sm:$0xff] %vm63_vm1, %v839_v27 }
 0x1d7   :  { %1066 = vmatmul.msk.f32.gmra.mxu2 %vm321_vm2, %v557_v28  ;;  %1098 = vmatmul.msk.f32.gmra.mxu3 %vm321_vm2, %v557_v28 }
 0x1da   :  { %v516_v29 = vpop.f32.mrf.mxu1  ;;  %v728_v30 = vpop.f32.mrf.mxu2 }
 0x1db   :  { %v517_v31 = vadd.f32 %v1389_v43, %v516_v29  ;;  %v729_v32 = vadd.f32 %v728_v30, %v1477_v25  ;;  %v841_v33 = vpop.f32.mrf.mxu3 }
 0x1dc   :  { %v842_v34 = vadd.f32 %v841_v33, %v1479_v18 }
 0x1dd   :  { %v558_v35 = vmax.f32 %v517_v31, 0.0  ;;  %927 = vst [vmem:[%s1821_s7 + $0xa0] sm:$0xff] %v729_v32 }
 0x1de   :  { %928 = vst.msk [vmem:[%s1821_s7 + $0xa8] sm:$0xff] %vm63_vm1, %v842_v34 }
 0x1df   :  { %1067 = vmatmul.msk.f32.gmra.mxu2 %vm321_vm2, %v558_v35  ;;  %1099 = vmatmul.msk.f32.gmra.mxu3 %vm321_vm2, %v558_v35 }
 0x1e2   :  { %v519_v36 = vpop.f32.mrf.mxu1  ;;  %v731_v37 = vpop.f32.mrf.mxu2 }
 0x1e3   :  { %v520_v38 = vadd.f32 %v1389_v43, %v519_v36  ;;  %v732_v39 = vadd.f32 %v731_v37, %v1477_v25  ;;  %v844_v40 = vpop.f32.mrf.mxu3 }
 0x1e4   :  { %v845_v41 = vadd.f32 %v844_v40, %v1479_v18 }
 0x1e5   :  { %v559_v42 = vmax.f32 %v520_v38, 0.0  ;;  %929 = vst [vmem:[%s1821_s7 + $0xb0] sm:$0xff] %v732_v39 }
 0x1e6   :  { %930 = vst.msk [vmem:[%s1821_s7 + $0xb8] sm:$0xff] %vm63_vm1, %v845_v41 }
 0x1e7   :  { %1068 = vmatmul.msk.f32.gmra.mxu2 %vm321_vm2, %v559_v42  ;;  %1100 = vmatmul.msk.f32.gmra.mxu3 %vm321_vm2, %v559_v42 }
 0x1ea   :  { %v522_v44 = vpop.f32.mrf.mxu1  ;;  %v734_v45 = vpop.f32.mrf.mxu2 }
 0x1eb   :  { %v523_v46 = vadd.f32 %v1389_v43, %v522_v44  ;;  %v735_v47 = vadd.f32 %v734_v45, %v1477_v25  ;;  %v847_v48 = vpop.f32.mrf.mxu3 }
 0x1ec   :  { %v848_v49 = vadd.f32 %v847_v48, %v1479_v18 }
 0x1ed   :  { %v560_v50 = vmax.f32 %v523_v46, 0.0  ;;  %931 = vst [vmem:[%s1821_s7 + $0xc0] sm:$0xff] %v735_v47 }
 0x1ee   :  { %932 = vst.msk [vmem:[%s1821_s7 + $0xc8] sm:$0xff] %vm63_vm1, %v848_v49 }
 0x1ef   :  { %1069 = vmatmul.msk.f32.gmra.mxu2 %vm321_vm2, %v560_v50  ;;  %1101 = vmatmul.msk.f32.gmra.mxu3 %vm321_vm2, %v560_v50 }
 0x1f2   :  { %v525_v51 = vpop.f32.mrf.mxu1  ;;  %v737_v52 = vpop.f32.mrf.mxu2 }
 0x1f3   :  { %v526_v53 = vadd.f32 %v1389_v43, %v525_v51  ;;  %v738_v54 = vadd.f32 %v737_v52, %v1477_v25  ;;  %v850_v55 = vpop.f32.mrf.mxu3 }
 0x1f4   :  { %v851_v56 = vadd.f32 %v850_v55, %v1479_v18 }
 0x1f5   :  { %v561_v57 = vmax.f32 %v526_v53, 0.0  ;;  %933 = vst [vmem:[%s1821_s7 + $0xd0] sm:$0xff] %v738_v54 }
 0x1f6   :  { %934 = vst.msk [vmem:[%s1821_s7 + $0xd8] sm:$0xff] %vm63_vm1, %v851_v56 }
 0x1f7   :  { %1070 = vmatmul.msk.f32.gmra.mxu2 %vm321_vm2, %v561_v57  ;;  %1102 = vmatmul.msk.f32.gmra.mxu3 %vm321_vm2, %v561_v57 }
 0x1fa   :  { %v528_v58 = vpop.f32.mrf.mxu1  ;;  %v740_v59 = vpop.f32.mrf.mxu2 }
 0x1fb   :  { %v529_v60 = vadd.f32 %v1389_v43, %v528_v58  ;;  %v741_v61 = vadd.f32 %v740_v59, %v1477_v25  ;;  %v853_v62 = vpop.f32.mrf.mxu3 }
 0x1fc   :  { %v854_v63 = vadd.f32 %v853_v62, %v1479_v18 }
 0x1fd   :  { %v562_v0 = vmax.f32 %v529_v60, 0.0  ;;  %935 = vst [vmem:[%s1821_s7 + $0xe0] sm:$0xff] %v741_v61 }
 0x1fe   :  { %936 = vst.msk [vmem:[%s1821_s7 + $0xe8] sm:$0xff] %vm63_vm1, %v854_v63 }
 0x1ff   :  { %1071 = vmatmul.msk.f32.gmra.mxu2 %vm321_vm2, %v562_v0  ;;  %1103 = vmatmul.msk.f32.gmra.mxu3 %vm321_vm2, %v562_v0 }
 0x202   :  { %v743_v43 = vpop.f32.mrf.mxu2 }
 0x203   :  { %v744_v1 = vadd.f32 %v743_v43, %v1477_v25  ;;  %v856_v2 = vpop.f32.mrf.mxu3 }
 0x204   :  { %v857_v3 = vadd.f32 %v856_v2, %v1479_v18 }
 0x205   :  { %937 = vst [vmem:[%s1821_s7 + $0xf0] sm:$0xff] %v744_v1 }
 0x206   :  { %938 = vst.msk [vmem:[%s1821_s7 + $0xf8] sm:$0xff] %vm63_vm1, %v857_v3 }
 0x20a   :  { %v746_v4 = vpop.f32.mrf.mxu2 }
 0x20b   :  { %v747_v5 = vadd.f32 %v746_v4, %v1477_v25  ;;  %v859_v6 = vpop.f32.mrf.mxu3 }
 0x20c   :  { %v860_v7 = vadd.f32 %v859_v6, %v1479_v18 }
 0x20d   :  { %939 = vst [vmem:[%s1821_s7 + $0x100] sm:$0xff] %v747_v5 }
 0x20e   :  { %940 = vst.msk [vmem:[%s1821_s7 + $0x108] sm:$0xff] %vm63_vm1, %v860_v7 }
 0x212   :  { %v749_v8 = vpop.f32.mrf.mxu2 }
 0x213   :  { %v750_v9 = vadd.f32 %v749_v8, %v1477_v25  ;;  %v862_v10 = vpop.f32.mrf.mxu3 }
 0x214   :  { %v863_v11 = vadd.f32 %v862_v10, %v1479_v18 }
 0x215   :  { %941 = vst [vmem:[%s1821_s7 + $0x110] sm:$0xff] %v750_v9 }
 0x216   :  { %942 = vst.msk [vmem:[%s1821_s7 + $0x118] sm:$0xff] %vm63_vm1, %v863_v11 }
 0x21a   :  { %v752_v12 = vpop.f32.mrf.mxu2 }
 0x21b   :  { %v753_v13 = vadd.f32 %v752_v12, %v1477_v25  ;;  %v865_v14 = vpop.f32.mrf.mxu3 }
 0x21c   :  { %v866_v15 = vadd.f32 %v865_v14, %v1479_v18 }
 0x21d   :  { %943 = vst [vmem:[%s1821_s7 + $0x120] sm:$0xff] %v753_v13 }
 0x21e   :  { %944 = vst.msk [vmem:[%s1821_s7 + $0x128] sm:$0xff] %vm63_vm1, %v866_v15 }
 0x222   :  { %v755_v16 = vpop.f32.mrf.mxu2 }
 0x223   :  { %v756_v17 = vadd.f32 %v755_v16, %v1477_v25  ;;  %v868_v19 = vpop.f32.mrf.mxu3 }
 0x224   :  { %v869_v20 = vadd.f32 %v868_v19, %v1479_v18 }
 0x225   :  { %945 = vst [vmem:[%s1821_s7 + $0x130] sm:$0xff] %v756_v17 }
 0x226   :  { %946 = vst.msk [vmem:[%s1821_s7 + $0x138] sm:$0xff] %vm63_vm1, %v869_v20 }
 0x22a   :  { %v758_v21 = vpop.f32.mrf.mxu2 }
 0x22b   :  { %v759_v22 = vadd.f32 %v758_v21, %v1477_v25  ;;  %v871_v23 = vpop.f32.mrf.mxu3 }
 0x22c   :  { %v872_v24 = vadd.f32 %v871_v23, %v1479_v18 }
 0x22d   :  { %947 = vst [vmem:[%s1821_s7 + $0x140] sm:$0xff] %v759_v22 }
 0x22e   :  { %948 = vst.msk [vmem:[%s1821_s7 + $0x148] sm:$0xff] %vm63_vm1, %v872_v24 }
 0x232   :  { %v761_v26 = vpop.f32.mrf.mxu2 }
 0x233   :  { %v762_v27 = vadd.f32 %v761_v26, %v1477_v25  ;;  %v874_v28 = vpop.f32.mrf.mxu3 }
 0x234   :  { %v875_v29 = vadd.f32 %v874_v28, %v1479_v18 }
 0x235   :  { %949 = vst [vmem:[%s1821_s7 + $0x150] sm:$0xff] %v762_v27 }
 0x236   :  { %950 = vst.msk [vmem:[%s1821_s7 + $0x158] sm:$0xff] %vm63_vm1, %v875_v29 }
 0x23a   :  { %v764_v30 = vpop.f32.mrf.mxu2 }
 0x23b   :  { %v765_v31 = vadd.f32 %v764_v30, %v1477_v25  ;;  %v877_v32 = vpop.f32.mrf.mxu3 }
 0x23c   :  { %v878_v33 = vadd.f32 %v877_v32, %v1479_v18 }
 0x23d   :  { %951 = vst [vmem:[%s1821_s7 + $0x160] sm:$0xff] %v765_v31 }
 0x23e   :  { %952 = vst.msk [vmem:[%s1821_s7 + $0x168] sm:$0xff] %vm63_vm1, %v878_v33 }
 0x242   :  { %v767_v34 = vpop.f32.mrf.mxu2 }
 0x243   :  { %v768_v35 = vadd.f32 %v767_v34, %v1477_v25  ;;  %v880_v36 = vpop.f32.mrf.mxu3 }
 0x244   :  { %v881_v37 = vadd.f32 %v880_v36, %v1479_v18 }
 0x245   :  { %953 = vst [vmem:[%s1821_s7 + $0x170] sm:$0xff] %v768_v35 }
 0x246   :  { %954 = vst.msk [vmem:[%s1821_s7 + $0x178] sm:$0xff] %vm63_vm1, %v881_v37 }
 0x24a   :  { %v770_v38 = vpop.f32.mrf.mxu2 }
 0x24b   :  { %v771_v39 = vadd.f32 %v770_v38, %v1477_v25  ;;  %v883_v40 = vpop.f32.mrf.mxu3 }
 0x24c   :  { %v884_v41 = vadd.f32 %v883_v40, %v1479_v18 }
 0x24d   :  { %955 = vst [vmem:[%s1821_s7 + $0x180] sm:$0xff] %v771_v39 }
 0x24e   :  { %956 = vst.msk [vmem:[%s1821_s7 + $0x188] sm:$0xff] %vm63_vm1, %v884_v41 }
 0x252   :  { %v773_v42 = vpop.f32.mrf.mxu2 }
 0x253   :  { %v774_v44 = vadd.f32 %v773_v42, %v1477_v25  ;;  %v886_v45 = vpop.f32.mrf.mxu3 }
 0x254   :  { %v887_v46 = vadd.f32 %v886_v45, %v1479_v18 }
 0x255   :  { %957 = vst [vmem:[%s1821_s7 + $0x190] sm:$0xff] %v774_v44 }
 0x256   :  { %958 = vst.msk [vmem:[%s1821_s7 + $0x198] sm:$0xff] %vm63_vm1, %v887_v46 }
 0x25a   :  { %v776_v47 = vpop.f32.mrf.mxu2 }
 0x25b   :  { %v777_v48 = vadd.f32 %v776_v47, %v1477_v25  ;;  %v889_v49 = vpop.f32.mrf.mxu3 }
 0x25c   :  { %v890_v50 = vadd.f32 %v889_v49, %v1479_v18 }
 0x25d   :  { %959 = vst [vmem:[%s1821_s7 + $0x1a0] sm:$0xff] %v777_v48 }
 0x25e   :  { %960 = vst.msk [vmem:[%s1821_s7 + $0x1a8] sm:$0xff] %vm63_vm1, %v890_v50 }
 0x262   :  { %v779_v51 = vpop.f32.mrf.mxu2 }
 0x263   :  { %v780_v52 = vadd.f32 %v779_v51, %v1477_v25  ;;  %v892_v53 = vpop.f32.mrf.mxu3 }
 0x264   :  { %v893_v54 = vadd.f32 %v892_v53, %v1479_v18 }
 0x265   :  { %961 = vst [vmem:[%s1821_s7 + $0x1b0] sm:$0xff] %v780_v52 }
 0x266   :  { %962 = vst.msk [vmem:[%s1821_s7 + $0x1b8] sm:$0xff] %vm63_vm1, %v893_v54 }
 0x26a   :  { %v782_v55 = vpop.f32.mrf.mxu2 }
 0x26b   :  { %v783_v56 = vadd.f32 %v782_v55, %v1477_v25  ;;  %v895_v57 = vpop.f32.mrf.mxu3 }
 0x26c   :  { %v896_v58 = vadd.f32 %v895_v57, %v1479_v18 }
 0x26d   :  { %963 = vst [vmem:[%s1821_s7 + $0x1c0] sm:$0xff] %v783_v56 }
 0x26e   :  { %964 = vst.msk [vmem:[%s1821_s7 + $0x1c8] sm:$0xff] %vm63_vm1, %v896_v58 }
 0x272   :  { %v785_v59 = vpop.f32.mrf.mxu2 }
 0x273   :  { %v786_v60 = vadd.f32 %v785_v59, %v1477_v25  ;;  %v898_v61 = vpop.f32.mrf.mxu3 }
 0x274   :  { %v899_v62 = vadd.f32 %v898_v61, %v1479_v18 }
 0x275   :  { %965 = vst [vmem:[%s1821_s7 + $0x1d0] sm:$0xff] %v786_v60 }
 0x276   :  { %966 = vst.msk [vmem:[%s1821_s7 + $0x1d8] sm:$0xff] %vm63_vm1, %v899_v62 }
 0x27a   :  { %v788_v63 = vpop.f32.mrf.mxu2 }
 0x27b   :  { %v789_v0 = vadd.f32 %v788_v63, %v1477_v25  ;;  %v901_v43 = vpop.f32.mrf.mxu3 }
 0x27c   :  { %v902_v1 = vadd.f32 %v901_v43, %v1479_v18 }
 0x27d   :  { %967 = vst [vmem:[%s1821_s7 + $0x1e0] sm:$0xff] %v789_v0 }
 0x27e   :  { %968 = vst.msk [vmem:[%s1821_s7 + $0x1e8] sm:$0xff] %vm63_vm1, %v902_v1 }
 0x282   :  { %v791_v2 = vpop.f32.mrf.mxu2 }
 0x283   :  { %v792_v3 = vadd.f32 %v791_v2, %v1477_v25  ;;  %v904_v4 = vpop.f32.mrf.mxu3 }
 0x284   :  { %v905_v5 = vadd.f32 %v904_v4, %v1479_v18 }
 0x285   :  { %969 = vst [vmem:[%s1821_s7 + $0x1f0] sm:$0xff] %v792_v3 }
 0x286   :  { %970 = vst.msk [vmem:[%s1821_s7 + $0x1f8] sm:$0xff] %vm63_vm1, %v905_v5 }

</bundles_post_ra>
